<compile_context>
chip_gen: v7x
topology: tpu7x:2x2x1
jax: 0.10.0
libtpu: 0.0.40
codegen_flags: <defaults>
</compile_context>

<pallas_src>
import functools

import jax
import jax.numpy as jnp
from jax.experimental import pallas as pl
from jax.experimental.pallas import tpu as pltpu


def _round_up(n, m):
    return ((n + m - 1) // m) * m


def _tanh_classifier_kernel(x_ref, w_ref, b_ref, o_ref, acc_ref, *, inv_f, f):
    """Tiled matmul with f32 accumulator; bias + scaled tanh only on the last k step."""
    k = pl.program_id(2)

    @pl.when(k == 0)
    def _():
        acc_ref[...] = jnp.zeros_like(acc_ref)

    # Pure MXU + accumulate in the inner reduction loop.
    acc_ref[...] += jnp.dot(x_ref[...], w_ref[...],
                            preferred_element_type=jnp.float32)

    @pl.when(k == pl.num_programs(2) - 1)
    def _():
        y = acc_ref[...] + b_ref[...]          # [tm, tn] + [1, tn]
        o_ref[...] = (jnp.tanh(y * inv_f) * f).astype(o_ref.dtype)


def prepack_params(weight, bias, *, o_tile_threshold=512):
    """One-time prepack (run at init, NOT per forward call).

    weight: PyTorch nn.Linear layout [O, D] -> kernel streaming layout [D_pad, O*] bf16
    bias:   [O] -> [1, O*] f32
    * D is padded to the next multiple of 128 only.
    * O is left UNPADDED when O <= o_tile_threshold (full-dim block, no wasted
      weight bytes); otherwise padded to a multiple of 128 for lane tiling.
    Returns (w_packed, bias2d, out_features).
    """
    O, D = weight.shape
    w = jnp.asarray(weight).T.astype(jnp.bfloat16)          # [D, O]
    D_pad = _round_up(D, 128)
    O_pad = O if O <= o_tile_threshold else _round_up(O, 128)
    if (D_pad, O_pad) != (D, O):
        w = jnp.pad(w, ((0, D_pad - D), (0, O_pad - O)))
    b2d = jnp.pad(jnp.asarray(bias, jnp.float32), (0, O_pad - O)).reshape(1, O_pad)
    return w, b2d, O


def tanh_classifier_forward(x, w_packed, b2d, out_features, tanh_factor,
                            *, out_dtype=jnp.float32):
    """x: [B, C, H, W] (or [B, D]); w_packed/b2d: outputs of prepack_params."""
    B = x.shape[0]
    x_flat = x.reshape(B, -1)                      # same as torch x.view(B, -1)
    D = x_flat.shape[1]
    D_pad, O_stream = w_packed.shape
    assert _round_up(D, 128) == D_pad, "weight was prepacked for a different input size"

    # bf16 feed (MXU-native, halves HBM bytes); skip the cast if already bf16.
    if x_flat.dtype != jnp.bfloat16:
        x_flat = x_flat.astype(jnp.bfloat16)

    # ---- tile selection -------------------------------------------------
    # Output/class tile: whole O when modest (j grid axis extent 1 -> x is
    # streamed exactly once); otherwise lane-dense 256/128 tiles.
    if O_stream <= 512:
        tn = O_stream
    else:
        tn = 256 if O_stream % 256 == 0 else 128

    # Batch tile: sublane-aligned; grow for large batches so the weight is
    # re-streamed fewer times.
    b8 = _round_up(B, 8)
    if b8 >= 2048 or b8 % 512 == 0:
        tm = 512
    elif b8 >= 1024 or b8 % 256 == 0:
        tm = 256
    elif b8 >= 128:
        tm = 128
    else:
        tm = b8

    # Reduction tile: largest 128-multiple divisor of D_pad, capped at 2048
    # (no reduction-axis overshoot padding, few grid steps).
    m_blocks = D_pad // 128
    div = 1
    for d in range(1, min(m_blocks, 16) + 1):
        if m_blocks % d == 0:
            div = d
    tk = 128 * div

    B_pad = _round_up(B, tm)
    if (B_pad, D_pad) != x_flat.shape:
        x_flat = jnp.pad(x_flat, ((0, B_pad - B), (0, D_pad - D)))

    grid = (B_pad // tm, O_stream // tn, D_pad // tk)

    # VMEM budget from the actual double-buffered footprint (clamped 32..48 MiB:
    # above v5e's 16 MiB scoped default, within v7x's 64 MiB physical).
    out_itemsize = jnp.dtype(out_dtype).itemsize
    vmem_need = (2 * tm * tk * 2          # x tiles (bf16, double-buffered)
                 + 2 * tk * tn * 2        # weight tiles (bf16, double-buffered)
                 + 2 * 1 * tn * 4         # bias tiles (f32)
                 + 2 * tm * tn * out_itemsize  # output tiles
                 + tm * tn * 4)           # accumulator scratch
    vmem_limit = int(min(48 * 1024 * 1024, max(32 * 1024 * 1024, 2 * vmem_need)))

    kernel = functools.partial(
        _tanh_classifier_kernel,
        inv_f=1.0 / float(tanh_factor),
        f=float(tanh_factor),
    )

    out = pl.pallas_call(
        kernel,
        out_shape=jax.ShapeDtypeStruct((B_pad, O_stream), out_dtype),
        grid_spec=pltpu.PrefetchScalarGridSpec(
            num_scalar_prefetch=0,
            grid=grid,
            in_specs=[
                pl.BlockSpec((tm, tk), lambda i, j, k: (i, k)),   # x tile
                pl.BlockSpec((tk, tn), lambda i, j, k: (k, j)),   # weight tile
                pl.BlockSpec((1, tn), lambda i, j, k: (0, j)),    # bias tile
            ],
            out_specs=pl.BlockSpec((tm, tn), lambda i, j, k: (i, j)),
            scratch_shapes=[pltpu.VMEM((tm, tn), jnp.float32)],
        ),
        compiler_params=pltpu.CompilerParams(
            dimension_semantics=("parallel", "parallel", "arbitrary"),
            vmem_limit_bytes=vmem_limit,
        ),
    )(x_flat, w_packed, b2d)

    return out[:B, :out_features]


def init_params(key, input_size, output_size):
    """Deterministic re-implementation of the module's init (PyTorch layout).

    Weight: tf.keras VarianceScaling(scale=0.1, mode='fan_in',
            distribution='truncated_normal') sampled at (in, out), then
            transposed to nn.Linear's [out, in].
    Bias:   PyTorch Linear default U(-1/sqrt(in), 1/sqrt(in)).
    """
    k_w, k_b = jax.random.split(key)
    fan_in = input_size
    stddev = jnp.sqrt(0.1 / fan_in) / 0.87962566103423978
    w_in_out = jax.random.truncated_normal(
        k_w, -2.0, 2.0, (input_size, output_size), dtype=jnp.float32) * stddev
    weight = w_in_out.T                                     # [out, in]
    bound = 1.0 / jnp.sqrt(jnp.asarray(fan_in, jnp.float32))
    bias = jax.random.uniform(k_b, (output_size,), jnp.float32, -bound, bound)
    return weight, bias


if __name__ == "__main__":
    key = jax.random.PRNGKey(0)
    k_x, k_p = jax.random.split(key)

    # Small shapes consistent with the module: x [B, C, H, W], flattened inside.
    B, C, H, W = 2, 4, 16, 16
    input_size = C * H * W          # 1024
    output_size = 32
    tanh_factor = 2.0

    x = jax.random.normal(k_x, (B, C, H, W), dtype=jnp.float32)
    weight, bias = init_params(k_p, input_size, output_size)   # [O, D] f32, [O] f32

    # One-time prepack (transpose + bf16 cast + padding) — NOT per call.
    w_packed, b2d, out_features = prepack_params(weight, bias)

    out = tanh_classifier_forward(x, w_packed, b2d, out_features, tanh_factor)
    out = jax.block_until_ready(out)

    # Reference check in plain JAX (f32, same math as the PyTorch forward).
    ref = jnp.tanh((x.reshape(B, -1) @ weight.T + bias) / tanh_factor) * tanh_factor
    assert out.shape == (B, output_size)
    # bf16 feed -> loosened tolerance vs the f32 reference.
    assert jnp.allclose(out, ref, atol=2e-2, rtol=2e-2), "mismatch vs reference"

    print("KERNEL_OK")
</pallas_src>

<mosaic_0001>
module attributes {stable_mosaic.version = 11 : i64} {
  func.func @_tanh_classifier_kernel(%arg0: i32, %arg1: i32, %arg2: i32, %arg3: memref<8x1024xbf16, #tpu.memory_space<vmem>>, %arg4: memref<1024x32xbf16, #tpu.memory_space<vmem>>, %arg5: memref<1x32xf32, #tpu.memory_space<vmem>>, %arg6: memref<8x32xf32, #tpu.memory_space<vmem>>, %arg7: memref<8x32xf32, #tpu.memory_space<vmem>>) attributes {dimension_semantics = [#tpu.dimension_semantics<parallel>, #tpu.dimension_semantics<parallel>, #tpu.dimension_semantics<arbitrary>], iteration_bounds = array<i64: 1, 1, 1>, scalar_prefetch = 0 : i64, scratch_operands = 1 : i64, tpu.core_type = #tpu.core_type<tc>, window_params = [{transform_indices = @transform_0, window_bounds = array<i64: 8, 1024>}, {transform_indices = @transform_1, window_bounds = array<i64: 1024, 32>}, {transform_indices = @transform_2, window_bounds = array<i64: 1, 32>}, {transform_indices = @transform_3, window_bounds = array<i64: 8, 32>}]} {
    %c0_i32 = arith.constant 0 : i32
    %0 = arith.cmpi eq, %arg2, %c0_i32 : i32
    %1 = arith.extui %0 : i1 to i32
    %c0_i32_0 = arith.constant 0 : i32
    %2 = arith.cmpi ne, %1, %c0_i32_0 : i32
    scf.if %2 {
      %cst_10 = arith.constant 0.000000e+00 : f32
      %12 = vector.broadcast %cst_10 : f32 to vector<8x32xf32>
      %c0_11 = arith.constant 0 : index
      %c0_12 = arith.constant 0 : index
      %13 = vector.load %arg7[%c0_11, %c0_12] : memref<8x32xf32, #tpu.memory_space<vmem>>, vector<8x32xf32>
      tpu.vector_store %arg7[%c0_11, %c0_12], %12 {strides = array<i32>} : memref<8x32xf32, #tpu.memory_space<vmem>>, vector<8x32xf32>,
    } else {
    }
    %c0 = arith.constant 0 : index
    %c0_1 = arith.constant 0 : index
    %3 = vector.load %arg7[%c0, %c0_1] : memref<8x32xf32, #tpu.memory_space<vmem>>, vector<8x32xf32>
    %c0_2 = arith.constant 0 : index
    %c0_3 = arith.constant 0 : index
    %4 = vector.load %arg3[%c0_2, %c0_3] : memref<8x1024xbf16, #tpu.memory_space<vmem>>, vector<8x1024xbf16>
    %c0_4 = arith.constant 0 : index
    %c0_5 = arith.constant 0 : index
    %5 = vector.load %arg4[%c0_4, %c0_5] : memref<1024x32xbf16, #tpu.memory_space<vmem>>, vector<1024x32xbf16>
    %cst = arith.constant dense<0.000000e+00> : vector<8x32xf32>
    %6 = tpu.matmul %4, %5, %cst {dimension_numbers = #tpu.dot_dimension_numbers<[1], [0], [0], [1], [0, 0, 1, 1], [], []>} : vector<8x1024xbf16>, vector<1024x32xbf16>, vector<8x32xf32> -> vector<8x32xf32>
    %7 = arith.addf %3, %6 : vector<8x32xf32>
    %c0_6 = arith.constant 0 : index
    %c0_7 = arith.constant 0 : index
    %8 = vector.load %arg7[%c0_6, %c0_7] : memref<8x32xf32, #tpu.memory_space<vmem>>, vector<8x32xf32>
    tpu.vector_store %arg7[%c0_6, %c0_7], %7 {strides = array<i32>} : memref<8x32xf32, #tpu.memory_space<vmem>>, vector<8x32xf32>,
    %c0_i32_8 = arith.constant 0 : i32
    %9 = arith.cmpi eq, %arg2, %c0_i32_8 : i32
    %10 = arith.extui %9 : i1 to i32
    %c0_i32_9 = arith.constant 0 : i32
    %11 = arith.cmpi ne, %10, %c0_i32_9 : i32
    scf.if %11 {
      %c0_10 = arith.constant 0 : index
      %c0_11 = arith.constant 0 : index
      %12 = vector.load %arg7[%c0_10, %c0_11] : memref<8x32xf32, #tpu.memory_space<vmem>>, vector<8x32xf32>
      %c0_12 = arith.constant 0 : index
      %c0_13 = arith.constant 0 : index
      %13 = vector.load %arg5[%c0_12, %c0_13] : memref<1x32xf32, #tpu.memory_space<vmem>>, vector<1x32xf32>
      %14 = vector.broadcast %13 : vector<1x32xf32> to vector<8x32xf32>
      %15 = arith.addf %12, %14 : vector<8x32xf32>
      %cst_14 = arith.constant 5.000000e-01 : f32
      %16 = vector.broadcast %cst_14 : f32 to vector<8x32xf32>
      %17 = arith.mulf %15, %16 : vector<8x32xf32>
      %18 = math.tanh %17 : vector<8x32xf32>
      %cst_15 = arith.constant 2.000000e+00 : f32
      %19 = vector.broadcast %cst_15 : f32 to vector<8x32xf32>
      %20 = arith.mulf %18, %19 : vector<8x32xf32>
      %c0_16 = arith.constant 0 : index
      %c0_17 = arith.constant 0 : index
      %21 = vector.load %arg6[%c0_16, %c0_17] : memref<8x32xf32, #tpu.memory_space<vmem>>, vector<8x32xf32>
      tpu.vector_store %arg6[%c0_16, %c0_17], %20 {strides = array<i32>} : memref<8x32xf32, #tpu.memory_space<vmem>>, vector<8x32xf32>,
    } else {
    }
    return
  }
  func.func @transform_0(%arg0: i32, %arg1: i32, %arg2: i32) -> (i32, i32) {
    %c0_i32 = arith.constant 0 : i32
    return %arg0, %arg2 : i32, i32
  }
  func.func @transform_1(%arg0: i32, %arg1: i32, %arg2: i32) -> (i32, i32) {
    %c0_i32 = arith.constant 0 : i32
    return %arg2, %arg1 : i32, i32
  }
  func.func @transform_2(%arg0: i32, %arg1: i32, %arg2: i32) -> (i32, i32) {
    %c0_i32 = arith.constant 0 : i32
    %c0_i32_0 = arith.constant 0 : i32
    return %c0_i32, %arg1 : i32, i32
  }
  func.func @transform_3(%arg0: i32, %arg1: i32, %arg2: i32) -> (i32, i32) {
    %c0_i32 = arith.constant 0 : i32
    return %arg0, %arg1 : i32, i32
  }
}

</mosaic_0001>

<bundles_post_ra>
// kernel: tpu_custom_call.1
= control target key start
LH: loop header
LB: loop body
LE: loop exit
PB: predicated region body
PF: predicated region fallthrough
CT: control target
= control target key end

     0   :  { %s1265_s0 = inlined_call_operand.vmem [shape: bf16[8,1024], index: 0, kind: input, shape index: {}]   ;;  %s1266_s1 = inlined_call_operand.vmem [shape: bf16[1024,32], index: 1, kind: input, shape index: {}]   ;;  %s1267_s2 = inlined_call_operand.vmem [shape: f32[1,32], index: 2, kind: input, shape index: {}]   ;;  %s1268_s3 = inlined_call_operand.hbm [shape: f32[8,32], index: 3, kind: output, shape index: {}]  }
   0x1   :  { %v923_v0 = vld [vmem:[%s1266_s1 + $0x40] sm:$0xff]   ;;  %v927_v4 = vld [vmem:[%s1266_s1 + $0x48] sm:$0xff]   ;;  %v931_v8 = vld [vmem:[%s1266_s1 + $0x50] sm:$0xff]  }
   0x2   :  { %v924_v1 = vld [vmem:[%s1266_s1 + $0xc0] sm:$0xff]   ;;  %833 = vmatprep.subr.bf16.mxu0 %v923_v0  ;;  %v928_v5 = vld [vmem:[%s1266_s1 + $0xc8] sm:$0xff]   ;;  %v932_v9 = vld [vmem:[%s1266_s1 + $0xd0] sm:$0xff]  }
   0x3   :  { %v925_v2 = vld [vmem:[%s1266_s1] sm:$0xff]   ;;  %855 = vmatprep.subr.bf16.mxu1 %v924_v1  ;;  %v929_v6 = vld [vmem:[%s1266_s1 + $0x8] sm:$0xff]   ;;  %v933_v10 = vld [vmem:[%s1266_s1 + $0x10] sm:$0xff]  }
   0x4   :  { %v926_v3 = vld [vmem:[%s1266_s1 + $0x80] sm:$0xff]   ;;  %834 = vmatpush3.bf16.msra.mxu0 %v925_v2  ;;  %v930_v7 = vld [vmem:[%s1266_s1 + $0x88] sm:$0xff]   ;;  %v934_v11 = vld [vmem:[%s1266_s1 + $0x90] sm:$0xff]  }
   0x5   :  { %856 = vmatpush3.bf16.msra.mxu1 %v926_v3  ;;  %835 = vmatprep.subr.bf16.mxu0 %v927_v4  ;;  %v935_v12 = vld [vmem:[%s1266_s1 + $0x58] sm:$0xff]   ;;  %v939_v16 = vld [vmem:[%s1266_s1 + $0x60] sm:$0xff]   ;;  %v943_v20 = vld [vmem:[%s1266_s1 + $0x68] sm:$0xff]  }
   0x6   :  { %857 = vmatprep.subr.bf16.mxu1 %v928_v5  ;;  %v936_v13 = vld [vmem:[%s1266_s1 + $0xd8] sm:$0xff]   ;;  %v940_v17 = vld [vmem:[%s1266_s1 + $0xe0] sm:$0xff]   ;;  %v944_v21 = vld [vmem:[%s1266_s1 + $0xe8] sm:$0xff]  }
   0x7   :  { %v937_v14 = vld [vmem:[%s1266_s1 + $0x18] sm:$0xff]   ;;  %v941_v18 = vld [vmem:[%s1266_s1 + $0x20] sm:$0xff]   ;;  %v945_v22 = vld [vmem:[%s1266_s1 + $0x28] sm:$0xff]  }
   0x8   :  { %836 = vmatpush3.bf16.msra.mxu0 %v929_v6  ;;  %v938_v15 = vld [vmem:[%s1266_s1 + $0x98] sm:$0xff]   ;;  %v942_v19 = vld [vmem:[%s1266_s1 + $0xa0] sm:$0xff]   ;;  %v946_v23 = vld [vmem:[%s1266_s1 + $0xa8] sm:$0xff]  }
   0x9   :  { %858 = vmatpush3.bf16.msra.mxu1 %v930_v7  ;;  %837 = vmatprep.subr.bf16.mxu0 %v931_v8  ;;  %v947_v24 = vld [vmem:[%s1266_s1 + $0x70] sm:$0xff]   ;;  %v951_v28 = vld [vmem:[%s1266_s1 + $0x78] sm:$0xff]   ;;  %v23_v32 = vld [vmem:[%s1265_s0] sm:$0xff] }
   0xa   :  { %859 = vmatprep.subr.bf16.mxu1 %v932_v9  ;;  %v948_v25 = vld [vmem:[%s1266_s1 + $0xf0] sm:$0xff]   ;;  %v952_v29 = vld [vmem:[%s1266_s1 + $0xf8] sm:$0xff]   ;;  %v24_v33 = vld [vmem:[%s1265_s0 + $0x8] sm:$0xff]  ;;  %v760_v34 = vcombine.low %v23_v32, %v23_v32  ;;  %v761_v35 = vcombine.high %v23_v32, %v23_v32 }
   0xb   :  { %v949_v26 = vld [vmem:[%s1266_s1 + $0x30] sm:$0xff]   ;;  %v953_v30 = vld [vmem:[%s1266_s1 + $0x38] sm:$0xff]   ;;  %v762_v36 = vcombine.low %v24_v33, %v24_v33  ;;  %v763_v37 = vcombine.high %v24_v33, %v24_v33  ;;  %v959_v38 = vld [vmem:[%s1266_s1 + $0x140] sm:$0xff]  }
   0xc   :  { %838 = vmatpush3.bf16.msra.mxu0 %v933_v10  ;;  %v950_v27 = vld [vmem:[%s1266_s1 + $0xb0] sm:$0xff]   ;;  %v954_v31 = vld [vmem:[%s1266_s1 + $0xb8] sm:$0xff]   ;;  %v960_v39 = vld [vmem:[%s1266_s1 + $0x1c0] sm:$0xff]   ;;  %599 = vmatprep.mubr.bf16.mxu0 %v761_v35 }
   0xd   :  { %860 = vmatpush3.bf16.msra.mxu1 %v934_v11  ;;  %839 = vmatprep.subr.bf16.mxu0 %v935_v12  ;;  %v961_v40 = vld [vmem:[%s1266_s1 + $0x100] sm:$0xff]   ;;  %v963_v42 = vld [vmem:[%s1266_s1 + $0x148] sm:$0xff]   ;;  %v967_v46 = vld [vmem:[%s1266_s1 + $0x150] sm:$0xff]  }
   0xe   :  { %861 = vmatprep.subr.bf16.mxu1 %v936_v13  ;;  %639 = vmatprep.mubr.bf16.mxu1 %v763_v37  ;;  %v962_v41 = vld [vmem:[%s1266_s1 + $0x180] sm:$0xff]   ;;  %v964_v43 = vld [vmem:[%s1266_s1 + $0x1c8] sm:$0xff]   ;;  %v968_v47 = vld [vmem:[%s1266_s1 + $0x1d0] sm:$0xff]  }
   0xf   :  { %v965_v44 = vld [vmem:[%s1266_s1 + $0x108] sm:$0xff]   ;;  %v969_v48 = vld [vmem:[%s1266_s1 + $0x110] sm:$0xff]   ;;  %v971_v50 = vld [vmem:[%s1266_s1 + $0x158] sm:$0xff]  }
  0x10   :  { %840 = vmatpush3.bf16.msra.mxu0 %v937_v14  ;;  %v966_v45 = vld [vmem:[%s1266_s1 + $0x188] sm:$0xff]   ;;  %v970_v49 = vld [vmem:[%s1266_s1 + $0x190] sm:$0xff]   ;;  %v972_v51 = vld [vmem:[%s1266_s1 + $0x1d8] sm:$0xff]  }
  0x11   :  { %862 = vmatpush3.bf16.msra.mxu1 %v938_v15  ;;  %841 = vmatprep.subr.bf16.mxu0 %v939_v16  ;;  %v973_v52 = vld [vmem:[%s1266_s1 + $0x118] sm:$0xff]   ;;  %v975_v54 = vld [vmem:[%s1266_s1 + $0x160] sm:$0xff]   ;;  %v979_v58 = vld [vmem:[%s1266_s1 + $0x168] sm:$0xff]  }
  0x12   :  { %863 = vmatprep.subr.bf16.mxu1 %v940_v17  ;;  %v974_v53 = vld [vmem:[%s1266_s1 + $0x198] sm:$0xff]   ;;  %v976_v55 = vld [vmem:[%s1266_s1 + $0x1e0] sm:$0xff]   ;;  %v980_v59 = vld [vmem:[%s1266_s1 + $0x1e8] sm:$0xff]  }
  0x13   :  { %v977_v56 = vld [vmem:[%s1266_s1 + $0x120] sm:$0xff]   ;;  %v981_v60 = vld [vmem:[%s1266_s1 + $0x128] sm:$0xff]   ;;  %v983_v62 = vld [vmem:[%s1266_s1 + $0x170] sm:$0xff]  }
  0x14   :  { %842 = vmatpush3.bf16.msra.mxu0 %v941_v18  ;;  %v978_v57 = vld [vmem:[%s1266_s1 + $0x1a0] sm:$0xff]   ;;  %v982_v61 = vld [vmem:[%s1266_s1 + $0x1a8] sm:$0xff]   ;;  %v984_v63 = vld [vmem:[%s1266_s1 + $0x1f0] sm:$0xff]  }
  0x15   :  { %864 = vmatpush3.bf16.msra.mxu1 %v942_v19  ;;  %843 = vmatprep.subr.bf16.mxu0 %v943_v20  ;;  %v985_v0 = vld [vmem:[%s1266_s1 + $0x130] sm:$0xff]   ;;  %v987_v2 = vld [vmem:[%s1266_s1 + $0x178] sm:$0xff]  }
  0x16   :  { %865 = vmatprep.subr.bf16.mxu1 %v944_v21  ;;  %v986_v1 = vld [vmem:[%s1266_s1 + $0x1b0] sm:$0xff]   ;;  %v988_v3 = vld [vmem:[%s1266_s1 + $0x1f8] sm:$0xff]  }
  0x17   :  { %v989_v4 = vld [vmem:[%s1266_s1 + $0x138] sm:$0xff]   ;;  %v25_v6 = vld [vmem:[%s1265_s0 + $0x10] sm:$0xff] }
  0x18   :  { %844 = vmatpush3.bf16.msra.mxu0 %v945_v22  ;;  %v990_v5 = vld [vmem:[%s1266_s1 + $0x1b8] sm:$0xff]   ;;  %v764_v7 = vcombine.low %v25_v6, %v25_v6  ;;  %v765_v8 = vcombine.high %v25_v6, %v25_v6 }
  0x19   :  { %866 = vmatpush3.bf16.msra.mxu1 %v946_v23  ;;  %845 = vmatprep.subr.bf16.mxu0 %v947_v24  ;;  %v26_v9 = vld [vmem:[%s1265_s0 + $0x18] sm:$0xff] }
  0x1a   :  { %867 = vmatprep.subr.bf16.mxu1 %v948_v25 }
  0x1c   :  { %846 = vmatpush3.bf16.msra.mxu0 %v949_v26 }
  0x1d   :  { %868 = vmatpush3.bf16.msra.mxu1 %v950_v27  ;;  %847 = vmatprep.subr.bf16.mxu0 %v951_v28 }
  0x1e   :  { %869 = vmatprep.subr.bf16.mxu1 %v952_v29 }
  0x20   :  { %848 = vmatpush3.bf16.msra.mxu0 %v953_v30 }
  0x21   :  { %870 = vmatpush3.bf16.msra.mxu1 %v954_v31  ;;  %877 = vmatprep.subr.bf16.mxu0 %v959_v38 }
  0x22   :  { %899 = vmatprep.subr.bf16.mxu1 %v960_v39 }
  0x23   :  { %600 = vmatmul.mubr.bf16.vlgmr.msra.gmra.mrb[0].mxu0 %v760_v34 }
  0x24   :  { %640 = vmatmul.mubr.bf16.vlgmr.msra.gmra.mrb[0].mxu1 %v762_v36  ;;  %878 = vmatpush3.bf16.msra.mxu0 %v961_v40 }
  0x25   :  { %900 = vmatpush3.bf16.msra.mxu1 %v962_v41  ;;  %879 = vmatprep.subr.bf16.mxu0 %v963_v42 }
  0x26   :  { %901 = vmatprep.subr.bf16.mxu1 %v964_v43 }
  0x28   :  { %880 = vmatpush3.bf16.msra.mxu0 %v965_v44 }
  0x29   :  { %902 = vmatpush3.bf16.msra.mxu1 %v966_v45  ;;  %881 = vmatprep.subr.bf16.mxu0 %v967_v46 }
  0x2a   :  { %903 = vmatprep.subr.bf16.mxu1 %v968_v47 }
  0x2c   :  { %882 = vmatpush3.bf16.msra.mxu0 %v969_v48 }
  0x2d   :  { %904 = vmatpush3.bf16.msra.mxu1 %v970_v49  ;;  %883 = vmatprep.subr.bf16.mxu0 %v971_v50 }
  0x2e   :  { %905 = vmatprep.subr.bf16.mxu1 %v972_v51 }
  0x30   :  { %884 = vmatpush3.bf16.msra.mxu0 %v973_v52 }
  0x31   :  { %906 = vmatpush3.bf16.msra.mxu1 %v974_v53  ;;  %885 = vmatprep.subr.bf16.mxu0 %v975_v54 }
  0x32   :  { %907 = vmatprep.subr.bf16.mxu1 %v976_v55 }
  0x34   :  { %886 = vmatpush3.bf16.msra.mxu0 %v977_v56 }
  0x35   :  { %908 = vmatpush3.bf16.msra.mxu1 %v978_v57  ;;  %887 = vmatprep.subr.bf16.mxu0 %v979_v58 }
  0x36   :  { %909 = vmatprep.subr.bf16.mxu1 %v980_v59 }
  0x38   :  { %888 = vmatpush3.bf16.msra.mxu0 %v981_v60 }
  0x39   :  { %910 = vmatpush3.bf16.msra.mxu1 %v982_v61  ;;  %889 = vmatprep.subr.bf16.mxu0 %v983_v62 }
  0x3a   :  { %911 = vmatprep.subr.bf16.mxu1 %v984_v63 }
  0x3c   :  { %890 = vmatpush3.bf16.msra.mxu0 %v985_v0 }
  0x3d   :  { %912 = vmatpush3.bf16.msra.mxu1 %v986_v1  ;;  %891 = vmatprep.subr.bf16.mxu0 %v987_v2 }
  0x3e   :  { %913 = vmatprep.subr.bf16.mxu1 %v988_v3 }
  0x3f   :  { %8 = vsyncpa [#allocation4], 0  ;;  %v766_v10 = vcombine.low %v26_v9, %v26_v9  ;;  %v767_v11 = vcombine.high %v26_v9, %v26_v9  ;;  %679 = vmatprep.mubr.bf16.mxu0 %v765_v8  ;;  %vm20_vm0 = vcmask 261120   ;;  %v1021_v12 = vmov 0.0   ;;  %v832_v38 = vld [vmem:[%s1267_s2] ss:$0 sm:$0xff] }
  0x40   :  { %892 = vmatpush3.bf16.msra.mxu0 %v989_v4  ;;  %21 = vst.msk [vmem:[#allocation2] sm:$0xff] %vm20_vm0, %v1021_v12  ;;  %s1022_s13 = smov [#allocation3]  }
  0x41   :  { %914 = vmatpush3.bf16.msra.mxu1 %v990_v5  ;;  %719 = vmatprep.mubr.bf16.mxu1 %v767_v11  ;;  %s752_s14 = sshll.u32 %s1022_s13, 4  ;;  %s753_s14 = int_to_ptr.vmem [resolvable:$true] %s752_s14 }
  0x42   :  { %s997_s15 = scalar_lea.vmem %s753_s14, 128  ;;  %p1002_p1 = scmp.lt.s32.totalorder %s753_s14, %s753_s14 }
  0x43   :  { %680 = vmatmul.mubr.bf16.vlgmr.msra.gmra.mrb[4].mxu0 %v764_v7  ;;  %p998_p0 = scmp.ne.s32.totalorder %s753_s14, %s997_s15  ;;  %p1003_p2 = scmp.lt.s32.totalorder %s997_s15, %s997_s15 }
  0x44   :  { %720 = vmatmul.mubr.bf16.vlgmr.msra.gmra.mrb[4].mxu1 %v766_v10 }
  0x45   :  { %p1004_p3 = por %p1003_p2, %p1002_p1 }
  0x47   :  { %v22_v35 = vld [vmem:[#allocation2] sm:$0xff]  ;;  %p1005_p4 = pnand %p1004_p3, %p998_p0 }
  0xf6   :  { %v849_v13 = vpop.f32.mrb[0].mxu0 }
  0xf7   :  { %v871_v14 = vpop.f32.mrb[0].mxu1  ;;  %v850_v15 = vpop.f32.mrb[1].mxu0 }
  0xf8   :  { %v872_v16 = vpop.f32.mrb[1].mxu1  ;;  %v851_v17 = vadd.f32 %v850_v15, %v849_v13  ;;  %v852_v19 = vpop.f32.mrb[2].mxu0 }
  0xf9   :  { %v873_v18 = vadd.f32 %v872_v16, %v871_v14  ;;  %v874_v20 = vpop.f32.mrb[2].mxu1  ;;  %v853_v21 = vpop.f32.mrb[3].mxu0 }
  0xfa   :  { %v875_v22 = vpop.f32.mrb[3].mxu1 }
  0xfb   :  { %v642_v23 = vadd.f32 %v873_v18, %v851_v17 }
 0x116   :  { %v893_v24 = vpop.f32.mrb[4].mxu0 }
 0x117   :  { %v915_v25 = vpop.f32.mrb[4].mxu1  ;;  %v894_v26 = vpop.f32.mrb[5].mxu0 }
 0x118   :  { %v916_v27 = vpop.f32.mrb[5].mxu1  ;;  %v895_v28 = vadd.f32 %v894_v26, %v893_v24  ;;  %v896_v30 = vpop.f32.mrb[6].mxu0 }
 0x119   :  { %v917_v29 = vadd.f32 %v916_v27, %v915_v25  ;;  %v918_v31 = vpop.f32.mrb[6].mxu1  ;;  %v897_v32 = vpop.f32.mrb[7].mxu0 }
 0x11a   :  { %v919_v33 = vpop.f32.mrb[7].mxu1  ;;  %v682_v34 = vadd.f32 %v895_v28, %v642_v23 }
 0x11c   :  { %v722_v36 = vadd.f32 %v917_v29, %v682_v34 }
 0x11e   :  { %v727_v37 = vadd.f32 %v722_v36, %v22_v35 }
 0x120   :  { %729 = vst.msk [vmem:[#allocation2] sm:$0xff] %vm20_vm0, %v727_v37 }
 0x127   :  { %v733_v39 = vld [vmem:[#allocation2] sm:$0xff] }
 0x128   :  { %v741_v40 = vadd.f32 %v832_v38, %v733_v39 }
 0x12a   :  { %v742_v41 = vmul.f32 0.5, %v741_v40 }
 0x12c   :  { %995 = vtanh.f32 %v742_v41 }
 0x136   :  { %v996_v42 = vpop.eup %995 }
 0x137   :  { %v744_v43 = vmul.f32 2.0, %v996_v42 }
 0x139   :  { %745 = vst.msk [vmem:[#allocation3] sm:$0xff] %vm20_vm0, %v744_v43 }
 0x13a   :  { %1008 = shalt.err (!%p1005_p4)
}
 0x13b   :  { %s1009_s17 = scalar_lea.hbm %s1268_s3, 128 }
 0x13c   :  { %p1010_p5 = scmp.ne.s32.totalorder %s1268_s3, %s1009_s17  ;;  %p1013_p6 = scmp.lt.u32.totalorder %s1009_s17, %s1268_s3 }
 0x13e   :  { %p1015_p7 = pnand %p1013_p6, %p1010_p5 }
 0x140   :  { %1018 = shalt.err (!%p1015_p7)
}
 0x141   :  { %755 = dma.vmem_to_hbm [thread:$0]  %s753_s14, 128, %s1268_s3, [#allocation4]  }
 0x142   :  { %1019 = dma.done.wait [#allocation4], 128  }
 0x143   :  { %1020 = vsyncadd [#allocation4], 4294967168 }
 0x144   :  { %759 = vsyncpa [#allocation4], 1 }

</bundles_post_ra>
